<compile_context>
chip_gen: v5e
topology: v5e:2x2
jax: 0.10.0
libtpu: 0.0.40
codegen_flags: <defaults>
</compile_context>

<pallas_src>
import math
from functools import partial

import jax
import jax.numpy as jnp
from jax.experimental import pallas as pl
from jax.experimental.pallas import tpu as pltpu


# ----------------------------------------------------------------------------
# Fused kernel: both GCN blocks + activation + 4x-sum + interpolation + slicing
# ----------------------------------------------------------------------------
def _dm_gcn_kernel(diagnum, mednum, pronum,
                   inter_ref, adj1_ref, adj2_ref, d_ref, m_ref, p_ref,
                   m_out_ref, d_out_ref, p_out_ref,
                   e1_scratch, e2_scratch):
    # Build embeds1 = [dEmbed; mEmbed] and embeds2 = [pEmbed; mEmbed] in VMEM
    # (row offsets are multiples of 8 -> sublane-aligned copies).
    e1_scratch[pl.ds(0, diagnum), :] = d_ref[...]
    e1_scratch[pl.ds(diagnum, mednum), :] = m_ref[...]
    e2_scratch[pl.ds(0, pronum), :] = p_ref[...]
    e2_scratch[pl.ds(pronum, mednum), :] = m_ref[...]

    # relu(leaky_relu(x, 0.5)) == relu(x); sum of 4 identical terms == max(4x, 0)
    x1 = jnp.dot(adj1_ref[...], e1_scratch[...],
                 preferred_element_type=jnp.float32)
    g1 = jnp.maximum(4.0 * x1, 0.0)

    x2 = jnp.dot(adj2_ref[...], e2_scratch[...],
                 preferred_element_type=jnp.float32)
    g2 = jnp.maximum(4.0 * x2, 0.0)

    # mEmbed = t * g1[diag:] + (1 - t) * g2[pro:]  ==  m2 + t*(m1 - m2)
    t = inter_ref[0]
    m1 = g1[diagnum:, :]
    m2 = g2[pronum:, :]
    m_out_ref[...] = m2 + t * (m1 - m2)
    d_out_ref[...] = g1[:diagnum, :]
    p_out_ref[...] = g2[:pronum, :]


def dm_gcn_forward(params, adj1, adj2, diagnum, pronum):
    d, m, p = params["dEmbed"], params["mEmbed"], params["pEmbed"]
    mednum, f = m.shape
    n1 = diagnum + mednum
    n2 = pronum + mednum

    kernel = partial(_dm_gcn_kernel, diagnum, mednum, pronum)

    return pl.pallas_call(
        kernel,
        out_shape=(
            jax.ShapeDtypeStruct((mednum, f), jnp.float32),   # mEmbed
            jax.ShapeDtypeStruct((diagnum, f), jnp.float32),  # dEmbed_gcn
            jax.ShapeDtypeStruct((pronum, f), jnp.float32),   # pEmbed_gcn
        ),
        grid=(1,),
        in_specs=[
            pl.BlockSpec(memory_space=pltpu.MemorySpace.SMEM),   # inter scalar
            pl.BlockSpec((n1, n1), lambda i: (0, 0)),            # adj1
            pl.BlockSpec((n2, n2), lambda i: (0, 0)),            # adj2
            pl.BlockSpec((diagnum, f), lambda i: (0, 0)),        # dEmbed
            pl.BlockSpec((mednum, f), lambda i: (0, 0)),         # mEmbed
            pl.BlockSpec((pronum, f), lambda i: (0, 0)),         # pEmbed
        ],
        out_specs=(
            pl.BlockSpec((mednum, f), lambda i: (0, 0)),
            pl.BlockSpec((diagnum, f), lambda i: (0, 0)),
            pl.BlockSpec((pronum, f), lambda i: (0, 0)),
        ),
        scratch_shapes=[
            pltpu.VMEM((n1, f), jnp.float32),   # embeds1 = [d; m]
            pltpu.VMEM((n2, f), jnp.float32),   # embeds2 = [p; m]
        ],
        compiler_params=pltpu.CompilerParams(
            dimension_semantics=("arbitrary",)),
    )(params["inter"], adj1, adj2, d, m, p)
    # TODO(synk): for real graph sizes (large N), tile adj over a reduction
    # grid axis with a VMEM accumulator and move the activation/4x scaling
    # into a pl.when(k == last) finalize step; not needed at these sizes.


# ----------------------------------------------------------------------------
# Pure-JAX reference (mirrors the PyTorch forward literally)
# ----------------------------------------------------------------------------
def dm_gcn_reference(params, adj1, adj2, diagnum, pronum):
    def block(adj, emb):
        x = adj @ emb
        y = jnp.maximum(jnp.where(x >= 0, x, 0.5 * x), 0.0)  # relu(leaky_relu)
        return y + y + y + y                                   # sum of 4 identical

    e1 = jnp.concatenate([params["dEmbed"], params["mEmbed"]], axis=0)
    e2 = jnp.concatenate([params["pEmbed"], params["mEmbed"]], axis=0)
    g1 = block(adj1, e1)
    g2 = block(adj2, e2)
    t = params["inter"][0]
    m = t * g1[diagnum:] + (1.0 - t) * g2[pronum:]
    return m, g1[:diagnum], g2[:pronum]


def xavier_uniform(key, shape):
    # matches torch.nn.init.xavier_uniform_ for 2-D tensors
    fan_out, fan_in = shape
    bound = math.sqrt(6.0 / (fan_in + fan_out))
    return jax.random.uniform(key, shape, jnp.float32, minval=-bound, maxval=bound)


if __name__ == "__main__":
    # Small, sublane-aligned sizes; featuredim=128 keeps stores lane-dense.
    Diagnum, mednum, pronum, featuredim = 16, 24, 8, 128
    N1 = Diagnum + mednum
    N2 = pronum + mednum

    key = jax.random.PRNGKey(0)
    k_d, k_m, k_p, k_a1, k_a2 = jax.random.split(key, 5)

    params = {
        "dEmbed": xavier_uniform(k_d, (Diagnum, featuredim)),
        "mEmbed": xavier_uniform(k_m, (mednum, featuredim)),
        "pEmbed": xavier_uniform(k_p, (pronum, featuredim)),
        # torch.FloatTensor(1) is uninitialized; pick a deterministic value.
        "inter": jnp.array([0.3], dtype=jnp.float32),
    }

    # Dense adjacency matrices (torch.spmm == dense matmul semantics here).
    adj1 = jax.random.uniform(k_a1, (N1, N1), jnp.float32)
    adj1 = adj1 / jnp.sum(adj1, axis=1, keepdims=True)
    adj2 = jax.random.uniform(k_a2, (N2, N2), jnp.float32)
    adj2 = adj2 / jnp.sum(adj2, axis=1, keepdims=True)

    m_embed, d_embed_gcn, p_embed_gcn = dm_gcn_forward(
        params, adj1, adj2, Diagnum, pronum
    )
    jax.block_until_ready((m_embed, d_embed_gcn, p_embed_gcn))

    # sanity check against pure-JAX reference of the original semantics
    m_ref, d_ref, p_ref = dm_gcn_reference(params, adj1, adj2, Diagnum, pronum)
    assert m_embed.shape == (mednum, featuredim)
    assert d_embed_gcn.shape == (Diagnum, featuredim)
    assert p_embed_gcn.shape == (pronum, featuredim)
    assert jnp.allclose(m_embed, m_ref, atol=1e-5)
    assert jnp.allclose(d_embed_gcn, d_ref, atol=1e-5)
    assert jnp.allclose(p_embed_gcn, p_ref, atol=1e-5)

    print("KERNEL_OK")
</pallas_src>

<mosaic_0001>
module attributes {stable_mosaic.version = 11 : i64} {
  func.func @_dm_gcn_kernel(%arg0: i32, %arg1: memref<1xf32, #tpu.memory_space<smem>>, %arg2: memref<40x40xf32, #tpu.memory_space<vmem>>, %arg3: memref<32x32xf32, #tpu.memory_space<vmem>>, %arg4: memref<16x128xf32, #tpu.memory_space<vmem>>, %arg5: memref<24x128xf32, #tpu.memory_space<vmem>>, %arg6: memref<8x128xf32, #tpu.memory_space<vmem>>, %arg7: memref<24x128xf32, #tpu.memory_space<vmem>>, %arg8: memref<16x128xf32, #tpu.memory_space<vmem>>, %arg9: memref<8x128xf32, #tpu.memory_space<vmem>>, %arg10: memref<40x128xf32, #tpu.memory_space<vmem>>, %arg11: memref<32x128xf32, #tpu.memory_space<vmem>>) attributes {dimension_semantics = [#tpu.dimension_semantics<arbitrary>], iteration_bounds = array<i64: 1>, scalar_prefetch = 0 : i64, scratch_operands = 2 : i64, tpu.core_type = #tpu.core_type<tc>, window_params = [{transform_indices = @transform_0, window_bounds = array<i64: 1>}, {pipeline_mode = #tpu.pipeline_mode<synchronous>, transform_indices = @transform_1, window_bounds = array<i64: 40, 40>}, {pipeline_mode = #tpu.pipeline_mode<synchronous>, transform_indices = @transform_2, window_bounds = array<i64: 32, 32>}, {pipeline_mode = #tpu.pipeline_mode<synchronous>, transform_indices = @transform_3, window_bounds = array<i64: 16, 128>}, {pipeline_mode = #tpu.pipeline_mode<synchronous>, transform_indices = @transform_4, window_bounds = array<i64: 24, 128>}, {pipeline_mode = #tpu.pipeline_mode<synchronous>, transform_indices = @transform_5, window_bounds = array<i64: 8, 128>}, {pipeline_mode = #tpu.pipeline_mode<synchronous>, transform_indices = @transform_6, window_bounds = array<i64: 24, 128>}, {pipeline_mode = #tpu.pipeline_mode<synchronous>, transform_indices = @transform_7, window_bounds = array<i64: 16, 128>}, {pipeline_mode = #tpu.pipeline_mode<synchronous>, transform_indices = @transform_8, window_bounds = array<i64: 8, 128>}]} {
    %c0 = arith.constant 0 : index
    %c0_0 = arith.constant 0 : index
    %0 = vector.load %arg4[%c0, %c0_0] : memref<16x128xf32, #tpu.memory_space<vmem>>, vector<16x128xf32>
    %c0_1 = arith.constant 0 : index
    %c0_2 = arith.constant 0 : index
    %1 = vector.load %arg10[%c0_1, %c0_2] : memref<40x128xf32, #tpu.memory_space<vmem>>, vector<16x128xf32>
    tpu.vector_store %arg10[%c0_1, %c0_2], %0 {strides = array<i32>} : memref<40x128xf32, #tpu.memory_space<vmem>>, vector<16x128xf32>,
    %c0_3 = arith.constant 0 : index
    %c0_4 = arith.constant 0 : index
    %2 = vector.load %arg5[%c0_3, %c0_4] : memref<24x128xf32, #tpu.memory_space<vmem>>, vector<24x128xf32>
    %c16 = arith.constant 16 : index
    %c0_5 = arith.constant 0 : index
    %3 = vector.load %arg10[%c16, %c0_5] : memref<40x128xf32, #tpu.memory_space<vmem>>, vector<24x128xf32>
    tpu.vector_store %arg10[%c16, %c0_5], %2 {strides = array<i32>} : memref<40x128xf32, #tpu.memory_space<vmem>>, vector<24x128xf32>,
    %c0_6 = arith.constant 0 : index
    %c0_7 = arith.constant 0 : index
    %4 = vector.load %arg6[%c0_6, %c0_7] : memref<8x128xf32, #tpu.memory_space<vmem>>, vector<8x128xf32>
    %c0_8 = arith.constant 0 : index
    %c0_9 = arith.constant 0 : index
    %5 = vector.load %arg11[%c0_8, %c0_9] : memref<32x128xf32, #tpu.memory_space<vmem>>, vector<8x128xf32>
    tpu.vector_store %arg11[%c0_8, %c0_9], %4 {strides = array<i32>} : memref<32x128xf32, #tpu.memory_space<vmem>>, vector<8x128xf32>,
    %c0_10 = arith.constant 0 : index
    %c0_11 = arith.constant 0 : index
    %6 = vector.load %arg5[%c0_10, %c0_11] : memref<24x128xf32, #tpu.memory_space<vmem>>, vector<24x128xf32>
    %c8 = arith.constant 8 : index
    %c0_12 = arith.constant 0 : index
    %7 = vector.load %arg11[%c8, %c0_12] : memref<32x128xf32, #tpu.memory_space<vmem>>, vector<24x128xf32>
    tpu.vector_store %arg11[%c8, %c0_12], %6 {strides = array<i32>} : memref<32x128xf32, #tpu.memory_space<vmem>>, vector<24x128xf32>,
    %c0_13 = arith.constant 0 : index
    %c0_14 = arith.constant 0 : index
    %8 = vector.load %arg2[%c0_13, %c0_14] : memref<40x40xf32, #tpu.memory_space<vmem>>, vector<40x40xf32>
    %c0_15 = arith.constant 0 : index
    %c0_16 = arith.constant 0 : index
    %9 = vector.load %arg10[%c0_15, %c0_16] : memref<40x128xf32, #tpu.memory_space<vmem>>, vector<40x128xf32>
    %cst = arith.constant dense<0.000000e+00> : vector<40x128xf32>
    %10 = tpu.matmul %8, %9, %cst {dimension_numbers = #tpu.dot_dimension_numbers<[1], [0], [0], [1], [0, 0, 1, 1], [], []>} : vector<40x40xf32>, vector<40x128xf32>, vector<40x128xf32> -> vector<40x128xf32>
    %cst_17 = arith.constant 4.000000e+00 : f32
    %11 = vector.broadcast %cst_17 : f32 to vector<40x128xf32>
    %12 = arith.mulf %11, %10 : vector<40x128xf32>
    %cst_18 = arith.constant 0.000000e+00 : f32
    %13 = vector.broadcast %cst_18 : f32 to vector<40x128xf32>
    %14 = arith.maximumf %12, %13 : vector<40x128xf32>
    %c0_19 = arith.constant 0 : index
    %c0_20 = arith.constant 0 : index
    %15 = vector.load %arg3[%c0_19, %c0_20] : memref<32x32xf32, #tpu.memory_space<vmem>>, vector<32x32xf32>
    %c0_21 = arith.constant 0 : index
    %c0_22 = arith.constant 0 : index
    %16 = vector.load %arg11[%c0_21, %c0_22] : memref<32x128xf32, #tpu.memory_space<vmem>>, vector<32x128xf32>
    %cst_23 = arith.constant dense<0.000000e+00> : vector<32x128xf32>
    %17 = tpu.matmul %15, %16, %cst_23 {dimension_numbers = #tpu.dot_dimension_numbers<[1], [0], [0], [1], [0, 0, 1, 1], [], []>} : vector<32x32xf32>, vector<32x128xf32>, vector<32x128xf32> -> vector<32x128xf32>
    %cst_24 = arith.constant 4.000000e+00 : f32
    %18 = vector.broadcast %cst_24 : f32 to vector<32x128xf32>
    %19 = arith.mulf %18, %17 : vector<32x128xf32>
    %cst_25 = arith.constant 0.000000e+00 : f32
    %20 = vector.broadcast %cst_25 : f32 to vector<32x128xf32>
    %21 = arith.maximumf %19, %20 : vector<32x128xf32>
    %c0_26 = arith.constant 0 : index
    %22 = memref.load %arg1[%c0_26] : memref<1xf32, #tpu.memory_space<smem>>
    %23 = vector.extract_strided_slice %14 {offsets = [16, 0], sizes = [24, 128], strides = [1, 1]} : vector<40x128xf32> to vector<24x128xf32>
    %24 = vector.extract_strided_slice %21 {offsets = [8, 0], sizes = [24, 128], strides = [1, 1]} : vector<32x128xf32> to vector<24x128xf32>
    %25 = arith.subf %23, %24 : vector<24x128xf32>
    %26 = vector.broadcast %22 : f32 to vector<24x128xf32>
    %27 = arith.mulf %26, %25 : vector<24x128xf32>
    %28 = arith.addf %24, %27 : vector<24x128xf32>
    %c0_27 = arith.constant 0 : index
    %c0_28 = arith.constant 0 : index
    %29 = vector.load %arg7[%c0_27, %c0_28] : memref<24x128xf32, #tpu.memory_space<vmem>>, vector<24x128xf32>
    tpu.vector_store %arg7[%c0_27, %c0_28], %28 {strides = array<i32>} : memref<24x128xf32, #tpu.memory_space<vmem>>, vector<24x128xf32>,
    %30 = vector.extract_strided_slice %14 {offsets = [0, 0], sizes = [16, 128], strides = [1, 1]} : vector<40x128xf32> to vector<16x128xf32>
    %c0_29 = arith.constant 0 : index
    %c0_30 = arith.constant 0 : index
    %31 = vector.load %arg8[%c0_29, %c0_30] : memref<16x128xf32, #tpu.memory_space<vmem>>, vector<16x128xf32>
    tpu.vector_store %arg8[%c0_29, %c0_30], %30 {strides = array<i32>} : memref<16x128xf32, #tpu.memory_space<vmem>>, vector<16x128xf32>,
    %32 = vector.extract_strided_slice %21 {offsets = [0, 0], sizes = [8, 128], strides = [1, 1]} : vector<32x128xf32> to vector<8x128xf32>
    %c0_31 = arith.constant 0 : index
    %c0_32 = arith.constant 0 : index
    %33 = vector.load %arg9[%c0_31, %c0_32] : memref<8x128xf32, #tpu.memory_space<vmem>>, vector<8x128xf32>
    tpu.vector_store %arg9[%c0_31, %c0_32], %32 {strides = array<i32>} : memref<8x128xf32, #tpu.memory_space<vmem>>, vector<8x128xf32>,
    return
  }
  func.func @transform_0(%arg0: i32) -> i32 {
    %c0_i32 = arith.constant 0 : i32
    %c0_i32_0 = arith.constant 0 : i32
    return %c0_i32 : i32
  }
  func.func @transform_1(%arg0: i32) -> (i32, i32) {
    %c0_i32 = arith.constant 0 : i32
    %c0_i32_0 = arith.constant 0 : i32
    %c0_i32_1 = arith.constant 0 : i32
    return %c0_i32, %c0_i32_0 : i32, i32
  }
  func.func @transform_2(%arg0: i32) -> (i32, i32) {
    %c0_i32 = arith.constant 0 : i32
    %c0_i32_0 = arith.constant 0 : i32
    %c0_i32_1 = arith.constant 0 : i32
    return %c0_i32, %c0_i32_0 : i32, i32
  }
  func.func @transform_3(%arg0: i32) -> (i32, i32) {
    %c0_i32 = arith.constant 0 : i32
    %c0_i32_0 = arith.constant 0 : i32
    %c0_i32_1 = arith.constant 0 : i32
    return %c0_i32, %c0_i32_0 : i32, i32
  }
  func.func @transform_4(%arg0: i32) -> (i32, i32) {
    %c0_i32 = arith.constant 0 : i32
    %c0_i32_0 = arith.constant 0 : i32
    %c0_i32_1 = arith.constant 0 : i32
    return %c0_i32, %c0_i32_0 : i32, i32
  }
  func.func @transform_5(%arg0: i32) -> (i32, i32) {
    %c0_i32 = arith.constant 0 : i32
    %c0_i32_0 = arith.constant 0 : i32
    %c0_i32_1 = arith.constant 0 : i32
    return %c0_i32, %c0_i32_0 : i32, i32
  }
  func.func @transform_6(%arg0: i32) -> (i32, i32) {
    %c0_i32 = arith.constant 0 : i32
    %c0_i32_0 = arith.constant 0 : i32
    %c0_i32_1 = arith.constant 0 : i32
    return %c0_i32, %c0_i32_0 : i32, i32
  }
  func.func @transform_7(%arg0: i32) -> (i32, i32) {
    %c0_i32 = arith.constant 0 : i32
    %c0_i32_0 = arith.constant 0 : i32
    %c0_i32_1 = arith.constant 0 : i32
    return %c0_i32, %c0_i32_0 : i32, i32
  }
  func.func @transform_8(%arg0: i32) -> (i32, i32) {
    %c0_i32 = arith.constant 0 : i32
    %c0_i32_0 = arith.constant 0 : i32
    %c0_i32_1 = arith.constant 0 : i32
    return %c0_i32, %c0_i32_0 : i32, i32
  }
}

</mosaic_0001>

<bundles_post_ra>
// kernel: tpu_custom_call.1
= control target key start
LH: loop header
LB: loop body
LE: loop exit
PB: predicated region body
PF: predicated region fallthrough
CT: control target
= control target key end

     0   :  { %15 = vsyncpa [#allocation6], 0  ;;  %s659_s0 = inlined_call_operand.<no memory space> [shape: f32[1], index: 0, kind: input, shape index: {}]   ;;  %s660_s1 = inlined_call_operand.hbm [shape: f32[40,40], index: 1, kind: input, shape index: {}]   ;;  %s661_s2 = inlined_call_operand.hbm [shape: f32[32,32], index: 2, kind: input, shape index: {}]   ;;  %s662_s3 = inlined_call_operand.hbm [shape: f32[16,128], index: 3, kind: input, shape index: {}]   ;;  %s663_s4 = inlined_call_operand.hbm [shape: f32[24,128], index: 4, kind: input, shape index: {}]   ;;  %s664_s5 = inlined_call_operand.hbm [shape: f32[8,128], index: 5, kind: input, shape index: {}]   ;;  %s665_s6 = inlined_call_operand.hbm [shape: f32[24,128], index: 6, kind: output, shape index: {0}]   ;;  %s666_s7 = inlined_call_operand.hbm [shape: f32[16,128], index: 7, kind: output, shape index: {1}]   ;;  %s667_s8 = inlined_call_operand.hbm [shape: f32[8,128], index: 8, kind: output, shape index: {2}]  }
   0x1   :  { %16 = vsyncpa [#allocation9], 0 }
   0x2   :  { %17 = vsyncpa [#allocation12], 0 }
   0x3   :  { %18 = vsyncpa [#allocation7], 0 }
   0x4   :  { %19 = vsyncpa [#allocation16], 0  ;;  %s39_s29 = sshll.u32 %s661_s2, 4  ;;  %s550_s30 = smov [#allocation8]   ;;  %s40_s29 = int_to_ptr.hbm [resolvable:$true] %s39_s29 }
   0x5   :  { %s41_s9 = sshll.u32 %s550_s30, 4  ;;  %s65_s12 = sshll.u32 %s663_s4, 4  ;;  %s42_s9 = int_to_ptr.vmem [resolvable:$true] %s41_s9  ;;  %s66_s12 = int_to_ptr.hbm [resolvable:$true] %s65_s12 }
   0x6   :  { %s551_s13 = smov 128   ;;  %s552_s14 = smov 8  }
   0x7   :  { %47 = dma.hbm_to_vmem [thread:$0]  %s40_s29, 512, %s42_s9, [#allocation9], %s551_s13, %s551_s13, %s552_s14  }
   0x8   :  { %s553_s15 = smov [#allocation11]   ;;  %s26_s2 = sshll.u32 %s660_s1, 4  ;;  %s27_s2 = int_to_ptr.hbm [resolvable:$true] %s26_s2 }
   0x9   :  { %s67_s16 = sshll.u32 %s553_s15, 4  ;;  %s52_s20 = sshll.u32 %s662_s3, 4  ;;  %s68_s16 = int_to_ptr.vmem [resolvable:$true] %s67_s16  ;;  %s53_s20 = int_to_ptr.hbm [resolvable:$true] %s52_s20 }
   0xa   :  { %73 = dma.hbm_to_vmem [thread:$0]  %s66_s12, 384, %s68_s16, [#allocation12], %s551_s13, %s551_s13, %s552_s14  }
   0xb   :  { %s554_s21 = smov [#allocation5]   ;;  %s555_s23 = smov [#allocation10]  }
   0xc   :  { %s28_s22 = sshll.u32 %s554_s21, 4  ;;  %s54_s1 = sshll.u32 %s555_s23, 4  ;;  %s29_s22 = int_to_ptr.vmem [resolvable:$true] %s28_s22  ;;  %s55_s1 = int_to_ptr.vmem [resolvable:$true] %s54_s1 }
   0xd   :  { %34 = dma.hbm_to_vmem [thread:$0]  %s27_s2, 640, %s29_s22, [#allocation6], %s551_s13, %s551_s13, %s552_s14  }
   0xe   :  { %s79_s26 = sshll.u32 %s664_s5, 4  ;;  %s556_s3 = smov [#allocation13]   ;;  %s80_s26 = int_to_ptr.hbm [resolvable:$true] %s79_s26 }
   0xf   :  { %60 = dma.hbm_to_vmem [thread:$0]  %s53_s20, 256, %s55_s1, [#allocation9], %s551_s13, %s551_s13, %s552_s14  }
  0x10   :  { %s81_s27 = sshll.u32 %s556_s3, 4  ;;  %s82_s27 = int_to_ptr.vmem [resolvable:$true] %s81_s27 }
  0x11   :  { %84 = dma.hbm_to_vmem [thread:$0]  %s80_s26, 128, %s82_s27, [#allocation12]  }
  0x12   :  { %540 = dma.done.wait [#allocation6], 640  }
  0x13   :  { %541 = vsyncadd [#allocation6], 4294966656 }
  0x14   :  { %542 = dma.done.wait [#allocation9], 768  }
  0x15   :  { %543 = vsyncadd [#allocation9], 4294966528 }
  0x16   :  { %544 = dma.done.wait [#allocation12], 512  }
  0x17   :  { %545 = vsyncadd [#allocation12], 4294966784  ;;  %v111_v0 = vld [vmem:[#allocation11 + $0x10] sm:$0xff]  ;;  %v110_v1 = vld [vmem:[#allocation11 + $0x8] sm:$0xff]  ;;  %vm199_vm0 = vcmask 261120   ;;  %vm133_vm1 = vcmask 326656   ;;  %v253_v28 = vstv %s659_s0 }
  0x18   :  { %329 = vmatpush.msra.mxu2 %v111_v0  ;;  %334 = vmatpush.msra.mxu3 %v111_v0  ;;  %v109_v2 = vld [vmem:[#allocation11] sm:$0xff]  ;;  %v106_v3 = vld [vmem:[#allocation10 + $0x8] sm:$0xff]  ;;  %v105_v6 = vld [vmem:[#allocation10] sm:$0xff]  ;;  %s557_s5 = smov [#allocation15]   ;;  %s285_s9 = sshll.u32 %s666_s7, 4  ;;  %s286_s9 = int_to_ptr.hbm [resolvable:$true] %s285_s9 }
  0x19   :  { %160 = vmatpush.msra.mxu0 %v111_v0  ;;  %224 = vmatpush.msra.mxu1 %v111_v0  ;;  %v115_v4 = vld [vmem:[#allocation13] sm:$0xff]  ;;  %v123_v8 = vld [vmem:[#allocation5] sm:$0xff]  ;;  %v191_v9 = vld [vmem:[#allocation8] sm:$0xff]  ;;  %s283_s28 = sshll.u32 %s557_s5, 4  ;;  %s558_s12 = smov [#allocation17]   ;;  %s284_s28 = int_to_ptr.vmem [resolvable:$true] %s283_s28 }
  0x1a   :  { %330 = vmatpush.msra.mxu2 %v110_v1  ;;  %335 = vmatpush.msra.mxu3 %v110_v1  ;;  %v192_v5 = vld [vmem:[#allocation8 + $0x8] sm:$0xff]  ;;  %v193_v10 = vld [vmem:[#allocation8 + $0x10] sm:$0xff]  ;;  %v124_v12 = vld [vmem:[#allocation5 + $0x8] sm:$0xff]  ;;  %s297_s15 = sshll.u32 %s558_s12, 4  ;;  %s299_s18 = sshll.u32 %s667_s8, 4  ;;  %s298_s15 = int_to_ptr.vmem [resolvable:$true] %s297_s15  ;;  %s300_s18 = int_to_ptr.hbm [resolvable:$true] %s299_s18 }
  0x1b   :  { %161 = vmatpush.msra.mxu0 %v110_v1  ;;  %225 = vmatpush.msra.mxu1 %v110_v1  ;;  %v125_v7 = vld [vmem:[#allocation5 + $0x10] sm:$0xff]  ;;  %v126_v11 = vld [vmem:[#allocation5 + $0x18] sm:$0xff]  ;;  %v194_v13 = vld [vmem:[#allocation8 + $0x18] sm:$0xff]  ;;  %s559_s0 = smov [#allocation14]   ;;  %s272_s4 = sshll.u32 %s665_s6, 4  ;;  %s273_s4 = int_to_ptr.hbm [resolvable:$true] %s272_s4 }
  0x1c   :  { %331 = vmatpush.msra.mxu2 %v109_v2  ;;  %336 = vmatpush.msra.mxu3 %v109_v2  ;;  %v127_v14 = vld [vmem:[#allocation5 + $0x20] sm:$0xff]  ;;  %s270_s7 = sshll.u32 %s559_s0, 4  ;;  %s271_s7 = int_to_ptr.vmem [resolvable:$true] %s270_s7 }
  0x1d   :  { %162 = vmatpush.msra.mxu0 %v109_v2  ;;  %226 = vmatpush.msra.mxu1 %v109_v2 }
  0x1e   :  { %332 = vmatpush.msra.mxu2 %v106_v3  ;;  %337 = vmatpush.msra.mxu3 %v115_v4 }
  0x1f   :  { %326 = vmatmul.msk.f32.vlgmr.msra.gmra.mxu3 %vm199_vm0, %v192_v5  ;;  %163 = vmatpush.msra.mxu0 %v106_v3 }
  0x20   :  { %333 = vmatpush.msra.mxu2 %v105_v6  ;;  %227 = vmatpush.msra.mxu1 %v115_v4 }
  0x21   :  { %322 = vmatmul.msk.f32.vlgmr.msra.gmra.mxu2 %vm133_vm1, %v125_v7  ;;  %164 = vmatpush.msra.mxu0 %v105_v6 }
  0x22   :  { %320 = vmatmul.msk.f32.vlgmr.msra.gmra.mxu0 %vm133_vm1, %v123_v8  ;;  %325 = vmatmul.msk.f32.vlgmr.msra.gmra.mxu1 %vm199_vm0, %v191_v9 }
  0x27   :  { %327 = vmatmul.msk.f32.gmra.mxu3 %vm199_vm0, %v193_v10 }
  0x29   :  { %323 = vmatmul.msk.f32.gmra.mxu2 %vm133_vm1, %v126_v11 }
  0x2a   :  { %321 = vmatmul.msk.f32.gmra.mxu0 %vm133_vm1, %v124_v12 }
  0x2f   :  { %328 = vmatmul.msk.f32.gmra.mxu3 %vm199_vm0, %v194_v13 }
  0x31   :  { %324 = vmatmul.msk.f32.gmra.mxu2 %vm133_vm1, %v127_v14 }
  0x9f   :  { %v166_v15 = vpop.f32.mrf.mxu0  ;;  %v229_v16 = vpop.f32.mrf.mxu1 }
  0xa0   :  { %v181_v17 = vmul.f32 4.0, %v166_v15  ;;  %v241_v18 = vmul.f32 4.0, %v229_v16 }
  0xa2   :  { %v232_v19 = vpop.f32.mrf.mxu3  ;;  %v186_v20 = vmax.f32 %v181_v17, 0.0  ;;  %v245_v21 = vmax.f32 %v241_v18, 0.0 }
  0xa3   :  { %v242_v22 = vmul.f32 4.0, %v232_v19 }
  0xa4   :  { %v172_v23 = vpop.f32.mrf.mxu2  ;;  %263 = vst [vmem:[#allocation15] sm:$0xff] %v186_v20 }
  0xa5   :  { %v183_v24 = vmul.f32 4.0, %v172_v23  ;;  %v246_v25 = vmax.f32 %v242_v22, 0.0  ;;  %265 = vst [vmem:[#allocation17] sm:$0xff] %v245_v21 }
  0xa7   :  { %v188_v26 = vmax.f32 %v183_v24, 0.0  ;;  %v169_v27 = vpop.f32.mrf.mxu0 }
  0xa8   :  { %v182_v29 = vmul.f32 4.0, %v169_v27 }
  0xa9   :  { %v250_v30 = vsub.f32 %v188_v26, %v246_v25 }
  0xaa   :  { %v235_v31 = vpop.f32.mrf.mxu3  ;;  %v187_v32 = vmax.f32 %v182_v29, 0.0 }
  0xab   :  { %v254_v33 = vmul.f32 %v253_v28, %v250_v30  ;;  %v243_v34 = vmul.f32 4.0, %v235_v31 }
  0xac   :  { %v175_v35 = vpop.f32.mrf.mxu2  ;;  %264 = vst [vmem:[#allocation15 + $0x8] sm:$0xff] %v187_v32 }
  0xad   :  { %v257_v36 = vadd.f32 %v254_v33, %v246_v25  ;;  %v184_v37 = vmul.f32 4.0, %v175_v35  ;;  %v247_v38 = vmax.f32 %v243_v34, 0.0  ;;  %291 = dma.vmem_to_hbm [thread:$0]  %s284_s28, 256, %s286_s9, [#allocation16], %s551_s13, %s551_s13, %s552_s14  }
  0xae   :  { %302 = dma.vmem_to_hbm [thread:$0]  %s298_s15, 128, %s300_s18, [#allocation16]  }
  0xaf   :  { %260 = vst [vmem:[#allocation14] sm:$0xff] %v257_v36  ;;  %v189_v39 = vmax.f32 %v184_v37, 0.0 }
  0xb1   :  { %v251_v40 = vsub.f32 %v189_v39, %v247_v38 }
  0xb2   :  { %v238_v41 = vpop.f32.mrf.mxu3 }
  0xb3   :  { %v255_v42 = vmul.f32 %v253_v28, %v251_v40  ;;  %v244_v43 = vmul.f32 4.0, %v238_v41 }
  0xb4   :  { %v178_v44 = vpop.f32.mrf.mxu2 }
  0xb5   :  { %v258_v45 = vadd.f32 %v255_v42, %v247_v38  ;;  %v185_v46 = vmul.f32 4.0, %v178_v44  ;;  %v248_v47 = vmax.f32 %v244_v43, 0.0 }
  0xb7   :  { %261 = vst [vmem:[#allocation14 + $0x8] sm:$0xff] %v258_v45  ;;  %v190_v48 = vmax.f32 %v185_v46, 0.0 }
  0xb9   :  { %v252_v49 = vsub.f32 %v190_v48, %v248_v47 }
  0xbb   :  { %v256_v50 = vmul.f32 %v253_v28, %v252_v49 }
  0xbd   :  { %v259_v51 = vadd.f32 %v256_v50, %v248_v47 }
  0xbf   :  { %262 = vst [vmem:[#allocation14 + $0x10] sm:$0xff] %v259_v51 }
  0xc0   :  { %278 = dma.vmem_to_hbm [thread:$0]  %s271_s7, 384, %s273_s4, [#allocation7], %s551_s13, %s551_s13, %s552_s14  }
  0xc1   :  { %546 = dma.done.wait [#allocation7], 384  }
  0xc2   :  { %547 = vsyncadd [#allocation7], 4294966912 }
  0xc3   :  { %548 = dma.done.wait [#allocation16], 384  }
  0xc4   :  { %549 = vsyncadd [#allocation16], 4294966912 }
  0xc5   :  { %315 = vsyncpa [#allocation6], 1 }
  0xc6   :  { %316 = vsyncpa [#allocation9], 1 }
  0xc7   :  { %317 = vsyncpa [#allocation12], 1 }
  0xc8   :  { %318 = vsyncpa [#allocation7], 1 }
  0xc9   :  { %319 = vsyncpa [#allocation16], 1 }

</bundles_post_ra>
